<compile_context>
chip_gen: v7x
topology: tpu7x:2x2x1
jax: 0.10.0
libtpu: 0.0.40
codegen_flags: <defaults>
</compile_context>

<pallas_src>
import functools

import jax
import jax.numpy as jnp
from jax import lax
from jax.experimental import pallas as pl
from jax.experimental.pallas import tpu as pltpu


def _ce_label_smooth_kernel(x_ref, tgt_ref, out_ref, *,
                            epsilon: float, num_classes: int,
                            batch: int, block_b: int, mask_rows: bool):
    i = pl.program_id(0)

    x = x_ref[...]                                       # (TB, C) native dtype
    tgt = tgt_ref[...]                                   # (TB, 1) int32
    tb, c = x.shape

    # Row-wise smoothed-CE identity (sum_c t = 1):
    #   row_loss = m + lse - sum_c x * (eps/C + (1-eps)*[c==tgt])

    # Pass 1: row max in the native dtype (exact), accumulate in f32 after.
    m = jnp.max(x, axis=1, keepdims=True).astype(jnp.float32)      # (TB, 1)

    # Pass 2: single weighted reduction (replaces separate sum_x and x[tgt]).
    col_ids = lax.broadcasted_iota(jnp.int32, (tb, c), 1)
    w_hit = (1.0 - epsilon) + epsilon / num_classes
    w_miss = epsilon / num_classes
    w = jnp.where(col_ids == tgt, w_hit, w_miss)                   # (TB, C) f32
    wsum = jnp.sum(x.astype(jnp.float32) * w, axis=1, keepdims=True)

    # Pass 3: logsumexp tail (f32 math; EUP exp, XLU lane reduce).
    lse = jnp.log(jnp.sum(jnp.exp(x.astype(jnp.float32) - m),
                          axis=1, keepdims=True))                  # (TB, 1)

    row_loss = (m + lse) - wsum                                    # (TB, 1)

    if mask_rows:
        # Only the last tile can have padded rows; the select runs on (TB, 1)
        # only (negligible vs. the (TB, C) work) and guards against non-finite
        # garbage in the padded region.  Pallas also clips the out-of-bounds
        # rows of the output block on writeback.
        row_ids = i * block_b + lax.broadcasted_iota(jnp.int32, (tb, 1), 0)
        row_loss = jnp.where(row_ids < batch, row_loss, 0.0)

    out_ref[...] = row_loss


def _vmem_capacity_bytes() -> int:
    """Physical VMEM of the local TPU; conservative fallback if unavailable."""
    try:
        return int(pltpu.get_tpu_info().vmem_capacity_bytes)
    except Exception:
        return 64 << 20          # v7x-safe lower bound


def _pick_block_b(batch: int, num_classes: int, itemsize: int,
                  vmem_cap: int, max_block: int = 4096) -> int:
    """Batch tile: large enough to amortize the ~0.35us per-grid-step overhead,
    small enough that 2x double-buffered input tiles plus the f32 in-kernel
    intermediates stay inside the scoped VMEM limit of the local generation."""
    align = 8 * max(1, 4 // itemsize)          # 8 rows for f32, 16 for bf16
    if batch <= align:
        return batch                           # whole (tiny) batch in one block
    # Size from the f32 working set so the budget is input-dtype independent:
    # ~8 MiB tiles on 128 MiB-VMEM parts (v5e/v6e), ~4 MiB on 64 MiB (v7x).
    target_f32 = (8 << 20) if vmem_cap >= (96 << 20) else (4 << 20)
    tb = target_f32 // max(num_classes * 4, 1)
    tb = max(align, min(int(tb), max_block))
    tb = (tb // align) * align                 # sublane / packing aligned
    tb = min(tb, (batch // align) * align)     # block must not exceed the array
    return max(tb, align)


def cross_entropy_label_smooth(inputs, targets, epsilon: float = 0.1,
                               block_b: int | None = None):
    """inputs: (B, C) float logits (f32 or bf16); targets: (B,) int class ids."""
    B, C = inputs.shape
    itemsize = jnp.dtype(inputs.dtype).itemsize
    vmem_cap = _vmem_capacity_bytes()
    if block_b is None:
        block_b = _pick_block_b(B, C, itemsize, vmem_cap)
    grid = pl.cdiv(B, block_b)
    mask_rows = (B % block_b) != 0

    targets_2d = targets.astype(jnp.int32).reshape(B, 1)

    kernel = functools.partial(
        _ce_label_smooth_kernel,
        epsilon=float(epsilon), num_classes=int(C),
        batch=int(B), block_b=int(block_b), mask_rows=bool(mask_rows))

    # VMEM budget: 2x double-buffered input tiles + ~6 f32 tile-sized
    # intermediates (weight mask, products, exp, ...) + slack, capped below
    # physical VMEM (<= 48 MiB on v7x, <= 100 MiB on v5e/v6e).
    tile_in = block_b * C * itemsize
    tile_f32 = block_b * C * 4
    want = 2 * tile_in + 6 * tile_f32 + (2 << 20)
    cap = max(min(vmem_cap - (16 << 20), 100 << 20), 16 << 20)
    vmem_limit = int(min(max(want, 16 << 20), cap))

    row_losses = pl.pallas_call(
        kernel,
        out_shape=jax.ShapeDtypeStruct((B, 1), jnp.float32),
        grid_spec=pltpu.PrefetchScalarGridSpec(
            num_scalar_prefetch=0,
            grid=(grid,),
            in_specs=[
                pl.BlockSpec((block_b, C), lambda i: (i, 0)),   # logits tile
                pl.BlockSpec((block_b, 1), lambda i: (i, 0)),   # target ids
            ],
            out_specs=pl.BlockSpec((block_b, 1), lambda i: (i, 0)),  # per-row loss
        ),
        compiler_params=pltpu.CompilerParams(
            dimension_semantics=("parallel",),   # distinct output block per step
            vmem_limit_bytes=vmem_limit),
    )(inputs, targets_2d)

    # Final reduction + mean(0).sum() normalization in the wrapper.
    return jnp.sum(row_losses) * (1.0 / B)


def _reference(inputs, targets, epsilon=0.1):
    """Pure-JAX reference mirroring the PyTorch module."""
    B, C = inputs.shape
    log_probs = jax.nn.log_softmax(inputs.astype(jnp.float32), axis=1)
    t = jax.nn.one_hot(targets, C, dtype=jnp.float32)
    t = (1.0 - epsilon) * t + epsilon / C
    return jnp.sum(jnp.mean(-t * log_probs, axis=0))


if __name__ == "__main__":
    key = jax.random.PRNGKey(0)
    k1, k2, k3, k4 = jax.random.split(key, 4)

    # Case 1: f32 logits, single batch tile.
    B1, C1 = 16, 32
    logits1 = jax.random.normal(k1, (B1, C1), dtype=jnp.float32)
    labels1 = jax.random.randint(k2, (B1,), 0, C1, dtype=jnp.int32)
    loss1 = jax.block_until_ready(
        cross_entropy_label_smooth(logits1, labels1, epsilon=0.1))
    ref1 = _reference(logits1, labels1, epsilon=0.1)
    assert jnp.allclose(loss1, ref1, atol=1e-5, rtol=1e-5), (loss1, ref1)

    # Case 2: bf16 logits, multi-tile grid (block_b=16) with remainder-row
    # masking (B=24 is not a multiple of the tile).
    B2, C2 = 24, 16
    logits2 = jax.random.normal(k3, (B2, C2), dtype=jnp.float32).astype(jnp.bfloat16)
    labels2 = jax.random.randint(k4, (B2,), 0, C2, dtype=jnp.int32)
    loss2 = jax.block_until_ready(
        cross_entropy_label_smooth(logits2, labels2, epsilon=0.1, block_b=16))
    ref2 = _reference(logits2.astype(jnp.float32), labels2, epsilon=0.1)
    assert jnp.allclose(loss2, ref2, atol=1e-4, rtol=1e-4), (loss2, ref2)

    print("KERNEL_OK")
</pallas_src>

<mosaic_0001>
module attributes {stable_mosaic.version = 11 : i64} {
  func.func @_ce_label_smooth_kernel(%arg0: i32, %arg1: memref<16x32xf32, #tpu.memory_space<vmem>>, %arg2: memref<16x1xi32, #tpu.memory_space<vmem>>, %arg3: memref<16x1xf32, #tpu.memory_space<vmem>>) attributes {dimension_semantics = [#tpu.dimension_semantics<parallel>], iteration_bounds = array<i64: 1>, scalar_prefetch = 0 : i64, scratch_operands = 0 : i64, tpu.core_type = #tpu.core_type<tc>, window_params = [{transform_indices = @transform_0, window_bounds = array<i64: 16, 32>}, {transform_indices = @transform_1, window_bounds = array<i64: 16, 1>}, {transform_indices = @transform_2, window_bounds = array<i64: 16, 1>}]} {
    %c0 = arith.constant 0 : index
    %c0_0 = arith.constant 0 : index
    %0 = vector.load %arg1[%c0, %c0_0] : memref<16x32xf32, #tpu.memory_space<vmem>>, vector<16x32xf32>
    %c0_1 = arith.constant 0 : index
    %c0_2 = arith.constant 0 : index
    %1 = vector.load %arg2[%c0_1, %c0_2] : memref<16x1xi32, #tpu.memory_space<vmem>>, vector<16x1xi32>
    %cst = arith.constant dense<0xFF800000> : vector<16xf32>
    %2 = vector.multi_reduction <maximumf>, %0, %cst [1] : vector<16x32xf32> to vector<16xf32>
    %3 = vector.shape_cast %2 : vector<16xf32> to vector<16x1xf32>
    %4 = tpu.iota {dimensions = array<i32: 1>} : vector<16x32xi32>
    %5 = vector.broadcast %1 : vector<16x1xi32> to vector<16x32xi32>
    %6 = arith.cmpi eq, %4, %5 : vector<16x32xi32>
    %cst_3 = arith.constant 0.903124988 : f32
    %cst_4 = arith.constant 3.125000e-03 : f32
    %7 = vector.broadcast %cst_3 : f32 to vector<16x32xf32>
    %8 = vector.broadcast %cst_4 : f32 to vector<16x32xf32>
    %9 = arith.select %6, %7, %8 : vector<16x32xi1>, vector<16x32xf32>
    %10 = arith.mulf %0, %9 : vector<16x32xf32>
    %cst_5 = arith.constant dense<0.000000e+00> : vector<16xf32>
    %11 = vector.multi_reduction <add>, %10, %cst_5 [1] : vector<16x32xf32> to vector<16xf32>
    %12 = vector.shape_cast %11 : vector<16xf32> to vector<16x1xf32>
    %13 = vector.broadcast %3 : vector<16x1xf32> to vector<16x32xf32>
    %14 = arith.subf %0, %13 : vector<16x32xf32>
    %15 = math.exp %14 : vector<16x32xf32>
    %cst_6 = arith.constant dense<0.000000e+00> : vector<16xf32>
    %16 = vector.multi_reduction <add>, %15, %cst_6 [1] : vector<16x32xf32> to vector<16xf32>
    %17 = vector.shape_cast %16 : vector<16xf32> to vector<16x1xf32>
    %18 = math.log %17 : vector<16x1xf32>
    %19 = arith.addf %3, %18 : vector<16x1xf32>
    %20 = arith.subf %19, %12 : vector<16x1xf32>
    %c0_7 = arith.constant 0 : index
    %c0_8 = arith.constant 0 : index
    %21 = vector.load %arg3[%c0_7, %c0_8] : memref<16x1xf32, #tpu.memory_space<vmem>>, vector<16x1xf32>
    tpu.vector_store %arg3[%c0_7, %c0_8], %20 {strides = array<i32>} : memref<16x1xf32, #tpu.memory_space<vmem>>, vector<16x1xf32>,
    return
  }
  func.func @transform_0(%arg0: i32) -> (i32, i32) {
    %c0_i32 = arith.constant 0 : i32
    %c0_i32_0 = arith.constant 0 : i32
    return %arg0, %c0_i32 : i32, i32
  }
  func.func @transform_1(%arg0: i32) -> (i32, i32) {
    %c0_i32 = arith.constant 0 : i32
    %c0_i32_0 = arith.constant 0 : i32
    return %arg0, %c0_i32 : i32, i32
  }
  func.func @transform_2(%arg0: i32) -> (i32, i32) {
    %c0_i32 = arith.constant 0 : i32
    %c0_i32_0 = arith.constant 0 : i32
    return %arg0, %c0_i32 : i32, i32
  }
}

</mosaic_0001>

<bundles_post_ra>
// kernel: tpu_custom_call.1
= control target key start
LH: loop header
LB: loop body
LE: loop exit
PB: predicated region body
PF: predicated region fallthrough
CT: control target
= control target key end

     0   :  { %vm15_vm0 = vcmask 261120   ;;  %v81_v2 = vmov 0   ;;  %v22_v8 = vlaneseq  ;;  %v82_v17 = vmov 0.003125   ;;  %s122_s0 = inlined_call_operand.vmem [shape: f32[16,32], index: 0, kind: input, shape index: {}]   ;;  %s123_s1 = inlined_call_operand.vmem [shape: s32[16,1], index: 1, kind: input, shape index: {}]   ;;  %s124_s2 = inlined_call_operand.vmem [shape: f32[16,1], index: 2, kind: output, shape index: {}]  }
   0x1   :  { %v11_v0 = vld [vmem:[%s122_s0] sm:$0xff]  ;;  %v12_v1 = vld [vmem:[%s122_s0 + $0x8] sm:$0xff]  ;;  %71 = vset.pattern.permute.xlu1 %v81_v2  ;;  %72 = vset.pattern.permute.xlu0 %v81_v2  ;;  %vm62_vm3 = vcmask 7168  }
   0x2   :  { %v13_v3 = vld [vmem:[%s123_s1] sm:$0xff]  ;;  %v16_v4 = vsel %vm15_vm0, %v11_v0, -inf  ;;  %v14_v5 = vld [vmem:[%s123_s1 + $0x8] sm:$0xff]  ;;  %v19_v6 = vsel %vm15_vm0, %v12_v1, -inf  ;;  %v23_v13 = vand.u32 127, %v22_v8 }
   0x3   :  { %25 = vperm.xlu1 %71, %v13_v3   ;;  %17 = vmax.xlane.f32.xlu0 %v16_v4 }
   0x7   :  { %28 = vperm.xlu1 %71, %v14_v5   ;;  %20 = vmax.xlane.f32.xlu0 %v19_v6 }
  0x82   :  { %v26_v11 = vpop.permute.xlu1 %25 }
  0x83   :  { %vm30_vm1 = vcmp.eq.s32.totalorder %v23_v13, %v26_v11 }
  0x84   :  { %v32_v18 = vsel %vm30_vm1, 0.903125, %v82_v17 }
  0x85   :  { %v34_v19 = vmul.f32 %v32_v18, %v11_v0 }
  0x86   :  { %v29_v16 = vpop.permute.xlu1 %28 }
  0x87   :  { %vm31_vm2 = vcmp.eq.s32.totalorder %v23_v13, %v29_v16  ;;  %v36_v23 = vsel %vm15_vm0, %v34_v19, 0.0 }
  0x88   :  { %v33_v21 = vsel %vm31_vm2, 0.903125, %v82_v17 }
  0x89   :  { %v35_v24 = vmul.f32 %v33_v21, %v12_v1 }
  0x8b   :  { %v39_v27 = vsel %vm15_vm0, %v35_v24, 0.0 }
  0x90   :  { %v18_v7 = vpop.xlane.xlu0 %17 }
  0x91   :  { %v42_v9 = vsub.f32 %v11_v0, %v18_v7 }
  0x93   :  { %v44_v10 = vmul.f32 1.442695, %v42_v9 }
  0x94   :  { %v21_v12 = vpop.xlane.xlu0 %20 }
  0x95   :  { %73 = vpow2.f32 %v44_v10  ;;  %v43_v14 = vsub.f32 %v12_v1, %v21_v12 }
  0x97   :  { %v46_v15 = vmul.f32 1.442695, %v43_v14 }
  0x99   :  { %75 = vpow2.f32 %v46_v15 }
  0x9f   :  { %v74_v20 = vpop.eup %73 }
  0xa0   :  { %v48_v22 = vsel %vm15_vm0, %v74_v20, 0.0 }
  0xa1   :  { %49 = vadd.xlane.f32.xlu0 %v48_v22 }
  0xa3   :  { %v76_v25 = vpop.eup %75 }
  0xa4   :  { %v51_v26 = vsel %vm15_vm0, %v76_v25, 0.0 }
  0xa5   :  { %52 = vadd.xlane.f32.xlu1 %v51_v26  ;;  %37 = vadd.xlane.f32.xlu0 %v36_v23 }
  0xa9   :  { %40 = vadd.xlane.f32.xlu0 %v39_v27 }
 0x12e   :  { %v50_v28 = vpop.xlane.xlu0 %49 }
 0x12f   :  { %77 = vlog2.f32 %v50_v28 }
 0x132   :  { %v53_v29 = vpop.xlane.xlu1 %52  ;;  %v38_v32 = vpop.xlane.xlu0 %37 }
 0x133   :  { %79 = vlog2.f32 %v53_v29 }
 0x136   :  { %v41_v38 = vpop.xlane.xlu0 %40 }
 0x139   :  { %v78_v30 = vpop.eup %77 }
 0x13a   :  { %v55_v31 = vmul.f32 0.6931472, %v78_v30 }
 0x13c   :  { %v58_v33 = vadd.f32 %v55_v31, %v18_v7 }
 0x13d   :  { %v80_v34 = vpop.eup %79 }
 0x13e   :  { %v57_v35 = vmul.f32 0.6931472, %v80_v34  ;;  %v60_v36 = vsub.f32 %v58_v33, %v38_v32 }
 0x140   :  { %63 = vst.msk [vmem:[%s124_s2] sm:$0xff] %vm62_vm3, %v60_v36  ;;  %v59_v37 = vadd.f32 %v57_v35, %v21_v12 }
 0x142   :  { %v61_v39 = vsub.f32 %v59_v37, %v41_v38 }
 0x144   :  { %64 = vst.msk [vmem:[%s124_s2 + $0x8] sm:$0xff] %vm62_vm3, %v61_v39 }

</bundles_post_ra>
